<compile_context>
chip_gen: v6e
topology: v6e:2x2x1
jax: 0.10.0
libtpu: 0.0.40
codegen_flags: <defaults>
</compile_context>

<pallas_src>
import functools

import jax
import jax.numpy as jnp
from jax.experimental import pallas as pl
from jax.experimental.pallas import tpu as pltpu


def _soft_hist_kernel(x_ref, o_ref, *, bins, min_val, delta, sigma, transpose_in):
    """One tile of the soft histogram.

    x_ref: (TR, L) if transpose_in else (L, TR)   (L = reduce dim)
    o_ref: (bins, TR)                             (lane-dense output tile)
    """
    x = x_ref[...].astype(jnp.float32)
    if transpose_in:
        # One on-chip transpose per tile (XLU), amortized over bins+1 EUP passes,
        # so the big row axis TR sits on the 128-wide lane axis for the tanh.
        x = x.T                                            # (L, TR)
    L = x.shape[0]
    half_sigma = 0.5 * float(sigma)
    ones_row = jnp.ones((1, L), jnp.float32)

    def edge_sum(e):
        # S_e[t] = sum_l tanh(0.5*sigma*(edge_e - x[l, t])),  edge_e = min + delta*e.
        # sigmoid(z) = 0.5*(tanh(z/2) + 1); the 0.5*L constants cancel below.
        edge = float(min_val) + float(delta) * float(e)    # static scalar (no iota)
        t = jnp.tanh(half_sigma * (edge - x))              # (L, TR): lane-dense EUP work
        # Reduce over L on the otherwise idle MXU (keeps XLU/VPU slots free).
        return jnp.dot(ones_row, t, preferred_element_type=jnp.float32)   # (1, TR)

    # bins+1 edges; out[k] = 0.5 * (S_{k+1} - S_k).  Streaming difference keeps
    # only two edge sums plus the output rows live.
    # NOTE: static unroll is fine for moderate `bins`; for very large `bins`
    # this loop should be chunked (e.g. 16 edges at a time) to bound code size.
    prev = edge_sum(0)
    rows = []
    for k in range(bins):
        cur = edge_sum(k + 1)
        rows.append(0.5 * (cur - prev))
        prev = cur
    o_ref[...] = jnp.concatenate(rows, axis=0).astype(o_ref.dtype)        # (bins, TR)


def soft_histogram_bchw(x, *, bins, min_val, max_val, sigma, hist_type='H',
                        tile_rows=None):
    """Pallas TPU equivalent of SoftHistogramBCHW.forward.

    x: (B, C, H, W).  Returns (B, C, H, bins) for hist_type='H' (reduce over W)
    or (B, C, W, bins) for hist_type='W' (reduce over H).
    """
    assert hist_type in ('H', 'W')
    assert bins >= 1
    B, C, H, W = x.shape
    delta = float(max_val - min_val) / float(bins)

    # Tiles here are only a few hundred KiB, so 32 MiB scoped VMEM is plenty
    # on every generation (including v7x's 64 MiB physical ceiling).
    vmem_limit = 32 * 1024 * 1024

    if hist_type == 'H':
        # Reduce over W.  (B, C, H, W) -> (N, W) is a free reshape (no data
        # movement); the flattened row axis N = B*C*H goes on lanes in-kernel.
        N = B * C * H
        x2 = x.reshape(N, W)
        if tile_rows is None:
            if N % 128 == 0:
                # Lane/sublane aligned; >= 2 grid steps (for v7x megacore) once N > 512.
                tile_rows = min(512, N)
            else:
                tile_rows = N if N <= 512 else 512
        kern = functools.partial(
            _soft_hist_kernel, bins=bins, min_val=float(min_val), delta=delta,
            sigma=float(sigma), transpose_in=True)
        out = pl.pallas_call(
            kern,
            out_shape=jax.ShapeDtypeStruct((bins, N), jnp.float32),
            grid_spec=pltpu.PrefetchScalarGridSpec(
                num_scalar_prefetch=0,
                grid=(pl.cdiv(N, tile_rows),),
                in_specs=[pl.BlockSpec((tile_rows, W), lambda i: (i, 0))],
                out_specs=pl.BlockSpec((bins, tile_rows), lambda i: (0, i)),
            ),
            compiler_params=pltpu.CompilerParams(
                dimension_semantics=("parallel",),
                vmem_limit_bytes=vmem_limit),
        )(x2)
        # Lane-dense (bins, N) stores in-kernel; cheap output-sized transpose here.
        return out.T.reshape(B, C, H, bins)

    # hist_type == 'W': reduce over H.  No wrapper-level swapaxes (no extra HBM
    # pass): an (H, TW) block of the original layout is already (reduce, rows)
    # oriented, with the W-tile on the lane axis.
    BC = B * C
    xg = x.reshape(BC, H, W)
    if tile_rows is None:
        if W % 128 == 0:
            tile_rows = min(512, W)
        else:
            tile_rows = W if W <= 512 else 512
    kern = functools.partial(
        _soft_hist_kernel, bins=bins, min_val=float(min_val), delta=delta,
        sigma=float(sigma), transpose_in=False)
    out = pl.pallas_call(
        kern,
        out_shape=jax.ShapeDtypeStruct((BC, bins, W), jnp.float32),
        grid_spec=pltpu.PrefetchScalarGridSpec(
            num_scalar_prefetch=0,
            grid=(BC, pl.cdiv(W, tile_rows)),
            in_specs=[pl.BlockSpec((None, H, tile_rows), lambda g, r: (g, 0, r))],
            out_specs=pl.BlockSpec((None, bins, tile_rows), lambda g, r: (g, 0, r)),
        ),
        compiler_params=pltpu.CompilerParams(
            dimension_semantics=("parallel", "parallel"),
            vmem_limit_bytes=vmem_limit),
    )(xg)
    return jnp.swapaxes(out, -1, -2).reshape(B, C, W, bins)


def _reference(x, *, bins, min_val, max_val, sigma, hist_type='H'):
    # Pure-JAX re-implementation of the PyTorch forward (validation only).
    delta = float(max_val - min_val) / float(bins)
    centers = min_val + delta * (jnp.arange(bins, dtype=jnp.float32) + 0.5)
    x_ = x if hist_type == 'H' else jnp.swapaxes(x, -1, -2)
    diff = centers[None, None, None, :, None] - x_[:, :, :, None, :]
    val = (jax.nn.sigmoid(sigma * (diff + delta / 2))
           - jax.nn.sigmoid(sigma * (diff - delta / 2)))
    return jnp.sum(val, axis=-1)


if __name__ == "__main__":
    key = jax.random.PRNGKey(0)
    B, C, H, W = 2, 4, 16, 16
    bins, min_val, max_val, sigma = 8, 0.0, 1.0, 75.0

    x = jax.random.uniform(key, (B, C, H, W), dtype=jnp.float32,
                           minval=min_val, maxval=max_val)

    out_h = soft_histogram_bchw(x, bins=bins, min_val=min_val, max_val=max_val,
                                sigma=sigma, hist_type='H')
    out_w = soft_histogram_bchw(x, bins=bins, min_val=min_val, max_val=max_val,
                                sigma=sigma, hist_type='W')
    jax.block_until_ready(out_h)
    jax.block_until_ready(out_w)

    ref_h = _reference(x, bins=bins, min_val=min_val, max_val=max_val,
                       sigma=sigma, hist_type='H')
    ref_w = _reference(x, bins=bins, min_val=min_val, max_val=max_val,
                       sigma=sigma, hist_type='W')

    assert out_h.shape == (B, C, H, bins)
    assert out_w.shape == (B, C, W, bins)
    # Edge-CDF + tanh formulation is mathematically identical to the sigmoid
    # difference; small tolerance covers f32 edge-constant rounding and the
    # EUP tanh approximation.
    assert jnp.allclose(out_h, ref_h, atol=5e-4, rtol=5e-4)
    assert jnp.allclose(out_w, ref_w, atol=5e-4, rtol=5e-4)

    print("KERNEL_OK")
</pallas_src>

<mosaic_0001>
module attributes {stable_mosaic.version = 11 : i64} {
  func.func @_soft_hist_kernel(%arg0: i32, %arg1: memref<128x16xf32, #tpu.memory_space<vmem>>, %arg2: memref<8x128xf32, #tpu.memory_space<vmem>>) attributes {dimension_semantics = [#tpu.dimension_semantics<parallel>], iteration_bounds = array<i64: 1>, scalar_prefetch = 0 : i64, scratch_operands = 0 : i64, tpu.core_type = #tpu.core_type<tc>, window_params = [{transform_indices = @transform_0, window_bounds = array<i64: 128, 16>}, {transform_indices = @transform_1, window_bounds = array<i64: 8, 128>}]} {
    %c0 = arith.constant 0 : index
    %c0_0 = arith.constant 0 : index
    %0 = vector.load %arg1[%c0, %c0_0] : memref<128x16xf32, #tpu.memory_space<vmem>>, vector<128x16xf32>
    %1 = tpu.transpose %0, [1, 0] : vector<128x16xf32> -> vector<16x128xf32>
    %cst = arith.constant 1.000000e+00 : f32
    %2 = vector.broadcast %cst : f32 to vector<1x16xf32>
    %cst_1 = arith.constant 0.000000e+00 : f32
    %3 = vector.broadcast %cst_1 : f32 to vector<16x128xf32>
    %4 = arith.subf %3, %1 : vector<16x128xf32>
    %cst_2 = arith.constant 3.750000e+01 : f32
    %5 = vector.broadcast %cst_2 : f32 to vector<16x128xf32>
    %6 = arith.mulf %5, %4 : vector<16x128xf32>
    %7 = math.tanh %6 : vector<16x128xf32>
    %cst_3 = arith.constant dense<0.000000e+00> : vector<1x128xf32>
    %8 = tpu.matmul %2, %7, %cst_3 {dimension_numbers = #tpu.dot_dimension_numbers<[1], [0], [0], [1], [0, 0, 1, 1], [], []>} : vector<1x16xf32>, vector<16x128xf32>, vector<1x128xf32> -> vector<1x128xf32>
    %cst_4 = arith.constant 1.250000e-01 : f32
    %9 = vector.broadcast %cst_4 : f32 to vector<16x128xf32>
    %10 = arith.subf %9, %1 : vector<16x128xf32>
    %cst_5 = arith.constant 3.750000e+01 : f32
    %11 = vector.broadcast %cst_5 : f32 to vector<16x128xf32>
    %12 = arith.mulf %11, %10 : vector<16x128xf32>
    %13 = math.tanh %12 : vector<16x128xf32>
    %cst_6 = arith.constant dense<0.000000e+00> : vector<1x128xf32>
    %14 = tpu.matmul %2, %13, %cst_6 {dimension_numbers = #tpu.dot_dimension_numbers<[1], [0], [0], [1], [0, 0, 1, 1], [], []>} : vector<1x16xf32>, vector<16x128xf32>, vector<1x128xf32> -> vector<1x128xf32>
    %15 = arith.subf %14, %8 : vector<1x128xf32>
    %cst_7 = arith.constant 5.000000e-01 : f32
    %16 = vector.broadcast %cst_7 : f32 to vector<1x128xf32>
    %17 = arith.mulf %16, %15 : vector<1x128xf32>
    %cst_8 = arith.constant 2.500000e-01 : f32
    %18 = vector.broadcast %cst_8 : f32 to vector<16x128xf32>
    %19 = arith.subf %18, %1 : vector<16x128xf32>
    %cst_9 = arith.constant 3.750000e+01 : f32
    %20 = vector.broadcast %cst_9 : f32 to vector<16x128xf32>
    %21 = arith.mulf %20, %19 : vector<16x128xf32>
    %22 = math.tanh %21 : vector<16x128xf32>
    %cst_10 = arith.constant dense<0.000000e+00> : vector<1x128xf32>
    %23 = tpu.matmul %2, %22, %cst_10 {dimension_numbers = #tpu.dot_dimension_numbers<[1], [0], [0], [1], [0, 0, 1, 1], [], []>} : vector<1x16xf32>, vector<16x128xf32>, vector<1x128xf32> -> vector<1x128xf32>
    %24 = arith.subf %23, %14 : vector<1x128xf32>
    %cst_11 = arith.constant 5.000000e-01 : f32
    %25 = vector.broadcast %cst_11 : f32 to vector<1x128xf32>
    %26 = arith.mulf %25, %24 : vector<1x128xf32>
    %cst_12 = arith.constant 3.750000e-01 : f32
    %27 = vector.broadcast %cst_12 : f32 to vector<16x128xf32>
    %28 = arith.subf %27, %1 : vector<16x128xf32>
    %cst_13 = arith.constant 3.750000e+01 : f32
    %29 = vector.broadcast %cst_13 : f32 to vector<16x128xf32>
    %30 = arith.mulf %29, %28 : vector<16x128xf32>
    %31 = math.tanh %30 : vector<16x128xf32>
    %cst_14 = arith.constant dense<0.000000e+00> : vector<1x128xf32>
    %32 = tpu.matmul %2, %31, %cst_14 {dimension_numbers = #tpu.dot_dimension_numbers<[1], [0], [0], [1], [0, 0, 1, 1], [], []>} : vector<1x16xf32>, vector<16x128xf32>, vector<1x128xf32> -> vector<1x128xf32>
    %33 = arith.subf %32, %23 : vector<1x128xf32>
    %cst_15 = arith.constant 5.000000e-01 : f32
    %34 = vector.broadcast %cst_15 : f32 to vector<1x128xf32>
    %35 = arith.mulf %34, %33 : vector<1x128xf32>
    %cst_16 = arith.constant 5.000000e-01 : f32
    %36 = vector.broadcast %cst_16 : f32 to vector<16x128xf32>
    %37 = arith.subf %36, %1 : vector<16x128xf32>
    %cst_17 = arith.constant 3.750000e+01 : f32
    %38 = vector.broadcast %cst_17 : f32 to vector<16x128xf32>
    %39 = arith.mulf %38, %37 : vector<16x128xf32>
    %40 = math.tanh %39 : vector<16x128xf32>
    %cst_18 = arith.constant dense<0.000000e+00> : vector<1x128xf32>
    %41 = tpu.matmul %2, %40, %cst_18 {dimension_numbers = #tpu.dot_dimension_numbers<[1], [0], [0], [1], [0, 0, 1, 1], [], []>} : vector<1x16xf32>, vector<16x128xf32>, vector<1x128xf32> -> vector<1x128xf32>
    %42 = arith.subf %41, %32 : vector<1x128xf32>
    %cst_19 = arith.constant 5.000000e-01 : f32
    %43 = vector.broadcast %cst_19 : f32 to vector<1x128xf32>
    %44 = arith.mulf %43, %42 : vector<1x128xf32>
    %cst_20 = arith.constant 6.250000e-01 : f32
    %45 = vector.broadcast %cst_20 : f32 to vector<16x128xf32>
    %46 = arith.subf %45, %1 : vector<16x128xf32>
    %cst_21 = arith.constant 3.750000e+01 : f32
    %47 = vector.broadcast %cst_21 : f32 to vector<16x128xf32>
    %48 = arith.mulf %47, %46 : vector<16x128xf32>
    %49 = math.tanh %48 : vector<16x128xf32>
    %cst_22 = arith.constant dense<0.000000e+00> : vector<1x128xf32>
    %50 = tpu.matmul %2, %49, %cst_22 {dimension_numbers = #tpu.dot_dimension_numbers<[1], [0], [0], [1], [0, 0, 1, 1], [], []>} : vector<1x16xf32>, vector<16x128xf32>, vector<1x128xf32> -> vector<1x128xf32>
    %51 = arith.subf %50, %41 : vector<1x128xf32>
    %cst_23 = arith.constant 5.000000e-01 : f32
    %52 = vector.broadcast %cst_23 : f32 to vector<1x128xf32>
    %53 = arith.mulf %52, %51 : vector<1x128xf32>
    %cst_24 = arith.constant 7.500000e-01 : f32
    %54 = vector.broadcast %cst_24 : f32 to vector<16x128xf32>
    %55 = arith.subf %54, %1 : vector<16x128xf32>
    %cst_25 = arith.constant 3.750000e+01 : f32
    %56 = vector.broadcast %cst_25 : f32 to vector<16x128xf32>
    %57 = arith.mulf %56, %55 : vector<16x128xf32>
    %58 = math.tanh %57 : vector<16x128xf32>
    %cst_26 = arith.constant dense<0.000000e+00> : vector<1x128xf32>
    %59 = tpu.matmul %2, %58, %cst_26 {dimension_numbers = #tpu.dot_dimension_numbers<[1], [0], [0], [1], [0, 0, 1, 1], [], []>} : vector<1x16xf32>, vector<16x128xf32>, vector<1x128xf32> -> vector<1x128xf32>
    %60 = arith.subf %59, %50 : vector<1x128xf32>
    %cst_27 = arith.constant 5.000000e-01 : f32
    %61 = vector.broadcast %cst_27 : f32 to vector<1x128xf32>
    %62 = arith.mulf %61, %60 : vector<1x128xf32>
    %cst_28 = arith.constant 8.750000e-01 : f32
    %63 = vector.broadcast %cst_28 : f32 to vector<16x128xf32>
    %64 = arith.subf %63, %1 : vector<16x128xf32>
    %cst_29 = arith.constant 3.750000e+01 : f32
    %65 = vector.broadcast %cst_29 : f32 to vector<16x128xf32>
    %66 = arith.mulf %65, %64 : vector<16x128xf32>
    %67 = math.tanh %66 : vector<16x128xf32>
    %cst_30 = arith.constant dense<0.000000e+00> : vector<1x128xf32>
    %68 = tpu.matmul %2, %67, %cst_30 {dimension_numbers = #tpu.dot_dimension_numbers<[1], [0], [0], [1], [0, 0, 1, 1], [], []>} : vector<1x16xf32>, vector<16x128xf32>, vector<1x128xf32> -> vector<1x128xf32>
    %69 = arith.subf %68, %59 : vector<1x128xf32>
    %cst_31 = arith.constant 5.000000e-01 : f32
    %70 = vector.broadcast %cst_31 : f32 to vector<1x128xf32>
    %71 = arith.mulf %70, %69 : vector<1x128xf32>
    %cst_32 = arith.constant 1.000000e+00 : f32
    %72 = vector.broadcast %cst_32 : f32 to vector<16x128xf32>
    %73 = arith.subf %72, %1 : vector<16x128xf32>
    %cst_33 = arith.constant 3.750000e+01 : f32
    %74 = vector.broadcast %cst_33 : f32 to vector<16x128xf32>
    %75 = arith.mulf %74, %73 : vector<16x128xf32>
    %76 = math.tanh %75 : vector<16x128xf32>
    %cst_34 = arith.constant dense<0.000000e+00> : vector<1x128xf32>
    %77 = tpu.matmul %2, %76, %cst_34 {dimension_numbers = #tpu.dot_dimension_numbers<[1], [0], [0], [1], [0, 0, 1, 1], [], []>} : vector<1x16xf32>, vector<16x128xf32>, vector<1x128xf32> -> vector<1x128xf32>
    %78 = arith.subf %77, %68 : vector<1x128xf32>
    %cst_35 = arith.constant 5.000000e-01 : f32
    %79 = vector.broadcast %cst_35 : f32 to vector<1x128xf32>
    %80 = arith.mulf %79, %78 : vector<1x128xf32>
    %81 = tpu.concatenate %17, %26, %35, %44, %53, %62, %71, %80 in 0 : vector<1x128xf32>, vector<1x128xf32>, vector<1x128xf32>, vector<1x128xf32>, vector<1x128xf32>, vector<1x128xf32>, vector<1x128xf32>, vector<1x128xf32> -> vector<8x128xf32>
    %c0_36 = arith.constant 0 : index
    %c0_37 = arith.constant 0 : index
    %82 = vector.load %arg2[%c0_36, %c0_37] : memref<8x128xf32, #tpu.memory_space<vmem>>, vector<8x128xf32>
    tpu.vector_store %arg2[%c0_36, %c0_37], %81 {strides = array<i32>} : memref<8x128xf32, #tpu.memory_space<vmem>>, vector<8x128xf32>,
    return
  }
  func.func @transform_0(%arg0: i32) -> (i32, i32) {
    %c0_i32 = arith.constant 0 : i32
    %c0_i32_0 = arith.constant 0 : i32
    return %arg0, %c0_i32 : i32, i32
  }
  func.func @transform_1(%arg0: i32) -> (i32, i32) {
    %c0_i32 = arith.constant 0 : i32
    %c0_i32_0 = arith.constant 0 : i32
    return %c0_i32, %arg0 : i32, i32
  }
}

</mosaic_0001>

<bundles_post_ra>
// kernel: tpu_custom_call.1
= control target key start
LH: loop header
LB: loop body
LE: loop exit
PB: predicated region body
PF: predicated region fallthrough
CT: control target
= control target key end

     0   :  { %s1113_s0 = inlined_call_operand.vmem [shape: f32[128,16], index: 0, kind: input, shape index: {}]   ;;  %s1114_s1 = inlined_call_operand.hbm [shape: f32[8,128], index: 1, kind: output, shape index: {}]  }
   0x1   :  { %v9_v0 = vld [vmem:[%s1113_s0] sm:$0xff]  ;;  %v10_v1 = vld [vmem:[%s1113_s0 + $0x8] sm:$0xff] }
   0x2   :  { %25 = vxpose.xlu0.b32.start [1/16] (narrow) %v9_v0, 16 }
   0x6   :  { %26 = vxpose.xlu0.b32.cont [2/16] (narrow) %v10_v1, 16 }
   0x7   :  { %6 = vsyncpa [#allocation3], 0  ;;  %v11_v2 = vld [vmem:[%s1113_s0 + $0x10] sm:$0xff]  ;;  %v12_v3 = vld [vmem:[%s1113_s0 + $0x18] sm:$0xff]  ;;  %v972_v6 = vmov 0.0   ;;  %vm973_vm0 = vmmov 0  }
   0x8   :  { %v13_v4 = vld [vmem:[%s1113_s0 + $0x20] sm:$0xff]  ;;  %v14_v5 = vld [vmem:[%s1113_s0 + $0x28] sm:$0xff]  ;;  %847 = vmatprep.subr.mxu0 %v972_v6  ;;  %854 = vmatprep.subr.mxu1 %v972_v6  ;;  %v15_v7 = vld [vmem:[%s1113_s0 + $0x30] sm:$0xff]  ;;  %vm63_vm1 = vcmask 130048   ;;  %v974_v57 = vmov 1.0   ;;  %vm782_vm2 = vcmask 1040384  }
   0x9   :  { %v16_v8 = vld [vmem:[%s1113_s0 + $0x38] sm:$0xff]  ;;  %v17_v9 = vld [vmem:[%s1113_s0 + $0x40] sm:$0xff]  ;;  %v18_v10 = vld [vmem:[%s1113_s0 + $0x48] sm:$0xff]  ;;  %851 = vmatprep.mubr.msk.f32.mxu0 %vm973_vm0, %v972_v6  ;;  %858 = vmatprep.mubr.msk.f32.mxu1 %vm973_vm0, %v972_v6  ;;  %vm784_vm3 = vcmask 1041408   ;;  %vm786_vm4 = vcmask 1042432   ;;  %vm788_vm5 = vcmask 1043456  }
   0xa   :  { %27 = vxpose.xlu0.b32.cont [3/16] (narrow) %v11_v2, 16  ;;  %v19_v11 = vld [vmem:[%s1113_s0 + $0x50] sm:$0xff]  ;;  %v20_v12 = vld [vmem:[%s1113_s0 + $0x58] sm:$0xff]  ;;  %v21_v13 = vld [vmem:[%s1113_s0 + $0x60] sm:$0xff]  ;;  %vm790_vm6 = vcmask 1044480   ;;  %vm792_vm7 = vcmask 1045504  }
   0xb   :  { %v22_v14 = vld [vmem:[%s1113_s0 + $0x68] sm:$0xff]  ;;  %v23_v15 = vld [vmem:[%s1113_s0 + $0x70] sm:$0xff]  ;;  %v24_v16 = vld [vmem:[%s1113_s0 + $0x78] sm:$0xff]  ;;  %s975_s0 = smov [#allocation2]   ;;  %vm794_vm8 = vcmask 1046528  }
   0xc   :  { %s803_s9 = sshll.u32 %s975_s0, 4  ;;  %s804_s9 = int_to_ptr.vmem [resolvable:$true] %s803_s9 }
   0xd   :  { %s950_s10 = scalar_lea.vmem %s804_s9, 128  ;;  %p955_p1 = scmp.lt.s32.totalorder %s804_s9, %s804_s9 }
   0xe   :  { %28 = vxpose.xlu0.b32.cont [4/16] (narrow) %v12_v3, 16  ;;  %p951_p0 = scmp.ne.s32.totalorder %s804_s9, %s950_s10  ;;  %p956_p2 = scmp.lt.s32.totalorder %s950_s10, %s950_s10 }
  0x10   :  { %p957_p3 = por %p956_p2, %p955_p1 }
  0x12   :  { %29 = vxpose.xlu0.b32.cont [5/16] (narrow) %v13_v4, 16  ;;  %p958_p4 = pnand %p957_p3, %p951_p0 }
  0x16   :  { %30 = vxpose.xlu0.b32.cont [6/16] (narrow) %v14_v5, 16 }
  0x1a   :  { %31 = vxpose.xlu0.b32.cont [7/16] (narrow) %v15_v7, 16 }
  0x1e   :  { %32 = vxpose.xlu0.b32.cont [8/16] (narrow) %v16_v8, 16 }
  0x22   :  { %33 = vxpose.xlu0.b32.cont [9/16] (narrow) %v17_v9, 16 }
  0x26   :  { %34 = vxpose.xlu0.b32.cont [10/16] (narrow) %v18_v10, 16 }
  0x2a   :  { %35 = vxpose.xlu0.b32.cont [11/16] (narrow) %v19_v11, 16 }
  0x2e   :  { %36 = vxpose.xlu0.b32.cont [12/16] (narrow) %v20_v12, 16 }
  0x32   :  { %37 = vxpose.xlu0.b32.cont [13/16] (narrow) %v21_v13, 16 }
  0x36   :  { %38 = vxpose.xlu0.b32.cont [14/16] (narrow) %v22_v14, 16 }
  0x3a   :  { %39 = vxpose.xlu0.b32.cont [15/16] (narrow) %v23_v15, 16 }
  0x3e   :  { %40 = vxpose.xlu0.b32.end [16/16] (narrow) %v24_v16, 16 }
  0x7e   :  { %v1040_v17 = vpop.trf.xlu0 }
  0x7f   :  { %v57_v21 = vsub.f32 0.0, %v1040_v17  ;;  %v137_v22 = vsub.f32 0.125, %v1040_v17  ;;  %v215_v29 = vsub.f32 0.25, %v1040_v17  ;;  %v293_v30 = vsub.f32 0.375, %v1040_v17 }
  0x80   :  { %v371_v37 = vsub.f32 0.5, %v1040_v17  ;;  %v449_v38 = vsub.f32 0.625, %v1040_v17  ;;  %v527_v45 = vsub.f32 0.75, %v1040_v17  ;;  %v605_v46 = vsub.f32 0.875, %v1040_v17 }
  0x81   :  { %v59_v26 = vmul.f32 37.5, %v57_v21  ;;  %v139_v28 = vmul.f32 37.5, %v137_v22  ;;  %v217_v33 = vmul.f32 37.5, %v215_v29  ;;  %v295_v35 = vmul.f32 37.5, %v293_v30 }
  0x82   :  { %v1042_v18 = vpop.trf.xlu0  ;;  %v373_v41 = vmul.f32 37.5, %v371_v37  ;;  %v451_v43 = vmul.f32 37.5, %v449_v38  ;;  %v529_v52 = vmul.f32 37.5, %v527_v45  ;;  %v607_v55 = vmul.f32 37.5, %v605_v46 }
  0x83   :  { %v58_v19 = vsub.f32 0.0, %v1042_v18  ;;  %v138_v20 = vsub.f32 0.125, %v1042_v18  ;;  %v216_v24 = vsub.f32 0.25, %v1042_v18  ;;  %v294_v27 = vsub.f32 0.375, %v1042_v18 }
  0x84   :  { %v372_v34 = vsub.f32 0.5, %v1042_v18  ;;  %v450_v36 = vsub.f32 0.625, %v1042_v18  ;;  %v528_v42 = vsub.f32 0.75, %v1042_v18  ;;  %v606_v44 = vsub.f32 0.875, %v1042_v18 }
  0x85   :  { %v60_v23 = vmul.f32 37.5, %v58_v19  ;;  %v140_v25 = vmul.f32 37.5, %v138_v20  ;;  %v218_v31 = vmul.f32 37.5, %v216_v24  ;;  %v296_v32 = vmul.f32 37.5, %v294_v27 }
  0x86   :  { %v374_v39 = vmul.f32 37.5, %v372_v34  ;;  %v452_v40 = vmul.f32 37.5, %v450_v36  ;;  %v530_v48 = vmul.f32 37.5, %v528_v42  ;;  %v608_v50 = vmul.f32 37.5, %v606_v44 }
  0x87   :  { %914 = vtanh.f32 %v60_v23  ;;  %v684_v53 = vsub.f32 1.0, %v1042_v18  ;;  %v683_v56 = vsub.f32 1.0, %v1040_v17 }
  0x88   :  { %916 = vtanh.f32 %v140_v25 }
  0x89   :  { %918 = vtanh.f32 %v59_v26  ;;  %v686_v60 = vmul.f32 37.5, %v684_v53  ;;  %v685_v63 = vmul.f32 37.5, %v683_v56 }
  0x8a   :  { %920 = vtanh.f32 %v139_v28 }
  0x8b   :  { %922 = vtanh.f32 %v218_v31 }
  0x8c   :  { %924 = vtanh.f32 %v296_v32 }
  0x8d   :  { %926 = vtanh.f32 %v217_v33 }
  0x8e   :  { %928 = vtanh.f32 %v295_v35 }
  0x8f   :  { %930 = vtanh.f32 %v374_v39 }
  0x90   :  { %932 = vtanh.f32 %v452_v40 }
  0x91   :  { %934 = vtanh.f32 %v373_v41 }
  0x92   :  { %936 = vtanh.f32 %v451_v43 }
  0x93   :  { %938 = vtanh.f32 %v530_v48 }
  0x94   :  { %v915_v47 = vpop.eup %914  ;;  %940 = vtanh.f32 %v608_v50 }
  0x95   :  { %v917_v49 = vpop.eup %916  ;;  %848 = vmatpush3.msra.mxu0 %v915_v47  ;;  %942 = vtanh.f32 %v529_v52 }
  0x96   :  { %v919_v51 = vpop.eup %918  ;;  %855 = vmatpush3.msra.mxu1 %v917_v49  ;;  %849 = vmatprep.subr.mxu0 %v972_v6  ;;  %944 = vtanh.f32 %v607_v55 }
  0x97   :  { %v921_v54 = vpop.eup %920  ;;  %856 = vmatprep.subr.mxu1 %v972_v6  ;;  %850 = vmatpush3.msra.mxu0 %v919_v51  ;;  %946 = vtanh.f32 %v686_v60 }
  0x98   :  { %857 = vmatpush3.msra.mxu1 %v921_v54  ;;  %852 = vmatmul.mubr.msk.f32.vlgmr.msra.gmra.mxu0 %vm63_vm1, %v974_v57  ;;  %v923_v58 = vpop.eup %922  ;;  %948 = vtanh.f32 %v685_v63 }
  0x99   :  { %861 = vmatprep.subr.mxu0 %v972_v6  ;;  %868 = vmatprep.subr.mxu1 %v972_v6  ;;  %v925_v59 = vpop.eup %924 }
  0x9a   :  { %859 = vmatmul.mubr.msk.f32.vlgmr.msra.gmra.mxu1 %vm63_vm1, %v974_v57  ;;  %862 = vmatpush3.msra.mxu0 %v923_v58  ;;  %v927_v61 = vpop.eup %926 }
  0x9b   :  { %869 = vmatpush3.msra.mxu1 %v925_v59  ;;  %863 = vmatprep.subr.mxu0 %v972_v6  ;;  %v929_v62 = vpop.eup %928 }
  0x9c   :  { %870 = vmatprep.subr.mxu1 %v972_v6  ;;  %864 = vmatpush3.msra.mxu0 %v927_v61  ;;  %v931_v0 = vpop.eup %930 }
  0x9d   :  { %865 = vmatprep.mubr.msk.f32.mxu0 %vm973_vm0, %v972_v6  ;;  %871 = vmatpush3.msra.mxu1 %v929_v62  ;;  %v933_v1 = vpop.eup %932 }
  0x9e   :  { %866 = vmatmul.mubr.msk.f32.vlgmr.msra.gmra.mxu0 %vm63_vm1, %v974_v57  ;;  %872 = vmatprep.mubr.msk.f32.mxu1 %vm973_vm0, %v972_v6  ;;  %v935_v2 = vpop.eup %934 }
  0x9f   :  { %875 = vmatprep.subr.mxu0 %v972_v6  ;;  %882 = vmatprep.subr.mxu1 %v972_v6  ;;  %v937_v3 = vpop.eup %936 }
  0xa0   :  { %873 = vmatmul.mubr.msk.f32.vlgmr.msra.gmra.mxu1 %vm63_vm1, %v974_v57  ;;  %876 = vmatpush3.msra.mxu0 %v931_v0  ;;  %v939_v4 = vpop.eup %938 }
  0xa1   :  { %883 = vmatpush3.msra.mxu1 %v933_v1  ;;  %877 = vmatprep.subr.mxu0 %v972_v6  ;;  %v941_v5 = vpop.eup %940 }
  0xa2   :  { %884 = vmatprep.subr.mxu1 %v972_v6  ;;  %878 = vmatpush3.msra.mxu0 %v935_v2  ;;  %v943_v7 = vpop.eup %942 }
  0xa3   :  { %879 = vmatprep.mubr.msk.f32.mxu0 %vm973_vm0, %v972_v6  ;;  %885 = vmatpush3.msra.mxu1 %v937_v3  ;;  %v945_v8 = vpop.eup %944 }
  0xa4   :  { %880 = vmatmul.mubr.msk.f32.vlgmr.msra.gmra.mxu0 %vm63_vm1, %v974_v57  ;;  %886 = vmatprep.mubr.msk.f32.mxu1 %vm973_vm0, %v972_v6  ;;  %v947_v9 = vpop.eup %946 }
  0xa5   :  { %889 = vmatprep.subr.mxu0 %v972_v6  ;;  %896 = vmatprep.subr.mxu1 %v972_v6  ;;  %v949_v10 = vpop.eup %948 }
  0xa6   :  { %887 = vmatmul.mubr.msk.f32.vlgmr.msra.gmra.mxu1 %vm63_vm1, %v974_v57  ;;  %890 = vmatpush3.msra.mxu0 %v939_v4 }
  0xa7   :  { %897 = vmatpush3.msra.mxu1 %v941_v5  ;;  %891 = vmatprep.subr.mxu0 %v972_v6 }
  0xa8   :  { %898 = vmatprep.subr.mxu1 %v972_v6  ;;  %892 = vmatpush3.msra.mxu0 %v943_v7 }
  0xa9   :  { %893 = vmatprep.mubr.msk.f32.mxu0 %vm973_vm0, %v972_v6  ;;  %899 = vmatpush3.msra.mxu1 %v945_v8 }
  0xaa   :  { %894 = vmatmul.mubr.msk.f32.vlgmr.msra.gmra.mxu0 %vm63_vm1, %v974_v57  ;;  %900 = vmatprep.mubr.msk.f32.mxu1 %vm973_vm0, %v972_v6 }
  0xab   :  { %903 = vmatprep.subr.mxu0 %v972_v6  ;;  %901 = vmatmul.mubr.msk.f32.vlgmr.msra.gmra.mxu1 %vm63_vm1, %v974_v57 }
  0xac   :  { %904 = vmatpush3.msra.mxu0 %v947_v9  ;;  %907 = vmatprep.mubr.msk.f32.mxu0 %vm973_vm0, %v972_v6 }
  0xad   :  { %905 = vmatprep.subr.mxu0 %v972_v6 }
  0xae   :  { %906 = vmatpush3.msra.mxu0 %v949_v10 }
  0xaf   :  { %908 = vmatmul.mubr.msk.f32.vlgmr.msra.gmra.mxu0 %vm63_vm1, %v974_v57 }
 0x158   :  { %v133_v11 = vpop.f32.mrf.mxu0 }
 0x15a   :  { %v209_v12 = vpop.f32.mrf.mxu1  ;;  %v853_v13 = vpop.f32.mrf.mxu0 }
 0x15b   :  { %v213_v22 = vsub.f32 %v209_v12, %v133_v11 }
 0x15c   :  { %v860_v14 = vpop.f32.mrf.mxu1 }
 0x15d   :  { %v214_v30 = vmul.f32 0.5, %v213_v22 }
 0x15e   :  { %v287_v15 = vpop.f32.mrf.mxu0 }
 0x15f   :  { %v291_v16 = vsub.f32 %v287_v15, %v209_v12 }
 0x160   :  { %v365_v17 = vpop.f32.mrf.mxu1  ;;  %v867_v18 = vpop.f32.mrf.mxu0 }
 0x161   :  { %v369_v19 = vsub.f32 %v365_v17, %v287_v15  ;;  %v292_v20 = vmul.f32 0.5, %v291_v16 }
 0x162   :  { %v874_v21 = vpop.f32.mrf.mxu1 }
 0x163   :  { %v370_v24 = vmul.f32 0.5, %v369_v19  ;;  %v762_v6 = vrot.slane %v292_v20, 7 }
 0x164   :  { %v443_v23 = vpop.f32.mrf.mxu0 }
 0x165   :  { %v447_v25 = vsub.f32 %v443_v23, %v365_v17  ;;  %v765_v32 = vrot.slane %v370_v24, 6  ;;  %v783_v34 = vsel %vm782_vm2, %v214_v30, %v762_v6 }
 0x166   :  { %v521_v26 = vpop.f32.mrf.mxu1  ;;  %v881_v27 = vpop.f32.mrf.mxu0 }
 0x167   :  { %v448_v28 = vmul.f32 0.5, %v447_v25  ;;  %v525_v29 = vsub.f32 %v521_v26, %v443_v23  ;;  %v785_v41 = vsel %vm784_vm3, %v783_v34, %v765_v32 }
 0x168   :  { %v888_v31 = vpop.f32.mrf.mxu1 }
 0x169   :  { %v526_v33 = vmul.f32 0.5, %v525_v29  ;;  %v768_v35 = vrot.slane %v448_v28, 5 }
 0x16a   :  { %v599_v36 = vpop.f32.mrf.mxu0 }
 0x16b   :  { %v603_v37 = vsub.f32 %v599_v36, %v521_v26  ;;  %v677_v38 = vpop.f32.mrf.mxu1  ;;  %v771_v42 = vrot.slane %v526_v33, 4  ;;  %v787_v45 = vsel %vm786_vm4, %v785_v41, %v768_v35 }
 0x16c   :  { %v681_v39 = vsub.f32 %v677_v38, %v599_v36  ;;  %v895_v40 = vpop.f32.mrf.mxu0 }
 0x16d   :  { %v604_v43 = vmul.f32 0.5, %v603_v37  ;;  %v902_v44 = vpop.f32.mrf.mxu1  ;;  %v789_v50 = vsel %vm788_vm5, %v787_v45, %v771_v42 }
 0x16e   :  { %v682_v46 = vmul.f32 0.5, %v681_v39 }
 0x16f   :  { %v774_v47 = vrot.slane %v604_v43, 3  ;;  %v755_v48 = vpop.f32.mrf.mxu0 }
 0x170   :  { %v759_v49 = vsub.f32 %v755_v48, %v677_v38  ;;  %v777_v51 = vrot.slane %v682_v46, 2 }
 0x171   :  { %v909_v52 = vpop.f32.mrf.mxu0  ;;  %v791_v54 = vsel %vm790_vm6, %v789_v50, %v774_v47 }
 0x172   :  { %v760_v53 = vmul.f32 0.5, %v759_v49  ;;  %v793_v56 = vsel %vm792_vm7, %v791_v54, %v777_v51 }
 0x174   :  { %v780_v55 = vrot.slane %v760_v53, 1 }
 0x176   :  { %v795_v57 = vsel %vm794_vm8, %v793_v56, %v780_v55 }
 0x177   :  { %796 = vst [vmem:[#allocation2] sm:$0xff] %v795_v57 }
 0x178   :  { %961 = shalt.err (!%p958_p4)
}
 0x179   :  { %806 = dma.vmem_to_hbm [thread:$0]  %s804_s9, 128, %s1114_s1, [#allocation3]  }
 0x17a   :  { %970 = dma.done.wait [#allocation3], 128  }
 0x17b   :  { %971 = vsyncadd [#allocation3], 4294967168 }
 0x17c   :  { %810 = vsyncpa [#allocation3], 1 }

</bundles_post_ra>
